<compile_context>
chip_gen: v6e
topology: v6e:2x2x1
jax: 0.10.0
libtpu: 0.0.40
codegen_flags: <defaults>
</compile_context>

<pallas_src>
import functools

import numpy as np
import jax
import jax.numpy as jnp
from jax.experimental import pallas as pl
from jax.experimental.pallas import tpu as pltpu

_INV_SQRT2 = float(1.0 / np.sqrt(2.0))
_GN_EPS = 1e-5
# tap order must match the host-side weight flattening in _prep_conv_weight
_TAPS = ((-1, -1), (-1, 0), (-1, 1),
         (0, -1), (0, 0), (0, 1),
         (1, -1), (1, 0), (1, 1))


def _rup8(n):
    return ((n + 7) // 8) * 8


# ----------------------------- in-kernel math -----------------------------
def _erf(x):
    # Abramowitz & Stegun 7.1.26, |err| < 1.5e-7 (f32-level accuracy);
    # uses only elementwise ops + exp so it lowers cleanly in Mosaic.
    p = 0.3275911
    a1, a2, a3, a4, a5 = (0.254829592, -0.284496736, 1.421413741,
                          -1.453152027, 1.061405429)
    sgn = jnp.where(x >= 0.0, 1.0, -1.0)
    ax = jnp.abs(x)
    t = 1.0 / (1.0 + p * ax)
    poly = ((((a5 * t + a4) * t + a3) * t + a2) * t + a1) * t
    return sgn * (1.0 - poly * jnp.exp(-ax * ax))


def _gelu(x):
    # exact (erf-based) GELU -- matches torch.nn.GELU() / F.gelu default
    return 0.5 * x * (1.0 + _erf(x * _INV_SQRT2))


# --------------------- pltpu.roll direction calibration ---------------------
@functools.lru_cache(maxsize=None)
def _roll_sign():
    """Probe pltpu.roll's rotation direction once: +1 if it matches np.roll,
    -1 if it rotates the opposite way.  Makes the tap-shift code
    convention-proof across jax versions."""
    n = 256
    base = np.arange(n, dtype=np.float32)
    x = jnp.asarray(np.tile(base, (8, 1)))

    def k(x_ref, o_ref):
        o_ref[...] = pltpu.roll(x_ref[...], 3, axis=1)

    y = pl.pallas_call(k, out_shape=jax.ShapeDtypeStruct((8, n), jnp.float32))(x)
    row = np.asarray(y)[0]
    if np.array_equal(row, np.roll(base, 3)):
        return 1
    if np.array_equal(row, np.roll(base, -3)):
        return -1
    raise RuntimeError("unexpected pltpu.roll semantics")


# ------------------------------- the kernel -------------------------------
def _up_kernel(x_ref, skip_ref, emb_ref, up_ref, mask_ref,
               w1a_ref, g1a_ref, b1a_ref,
               w1b_ref, g1b_ref, b1b_ref,
               w2a_ref, g2a_ref, b2a_ref,
               w2b_ref, g2b_ref, b2b_ref,
               o_ref, patch_ref, cat_ref, *,
               H, W, cs, cin0, cmid, cout, cp0, cpm, roll_sign):
    """One batch sample per grid step; activations are channel-major (C, H*W)."""
    HW = H * W

    def conv3x3(a, cpi, w_ref):
        # a: (cpi, HW); w_ref: (cpo, 9*cpi).  Build the im2col patch with lane
        # rolls of the flattened image + precomputed border masks, then run a
        # single MXU matmul.  Patch writes are sublane-aligned (cpi % 8 == 0).
        for tap, (dh, dw) in enumerate(_TAPS):
            s = dh * W + dw
            if s == 0:
                shifted = a
            else:
                amt = ((-s) * roll_sign) % HW
                shifted = pltpu.roll(a, amt, axis=1) * mask_ref[tap:tap + 1, :]
            patch_ref[tap * cpi:(tap + 1) * cpi, :] = shifted
        return jnp.dot(w_ref[...], patch_ref[0:9 * cpi, :],
                       preferred_element_type=jnp.float32)

    def group_norm(h, c_real, g_ref, b_ref):
        # GroupNorm(num_groups=1): stats over the c_real real channels of this
        # sample (biased variance, eps=1e-5).  Zero-padded channel rows add 0
        # to both sums and their affine params are zero, so they stay 0.
        denom = float(c_real * HW)
        mean = jnp.sum(h) / denom
        var = jnp.sum(h * h) / denom - mean * mean
        xn = (h - mean) * jax.lax.rsqrt(var + _GN_EPS)
        return xn * g_ref[...] + b_ref[...]

    # --- fused bilinear x2 upsample + channel concat -> (cp0, HW) -----------
    if cin0 != cp0:
        cat_ref[cin0:cp0, :] = jnp.zeros((cp0 - cin0, HW), jnp.float32)
    cat_ref[0:cs, :] = skip_ref[0]
    cat_ref[cs:cin0, :] = jnp.dot(x_ref[0], up_ref[...],
                                  preferred_element_type=jnp.float32)
    x0 = cat_ref[...]

    # --- DoubleConv #1 (residual, cin0 -> cin0 -> cin0) ----------------------
    h = conv3x3(x0, cp0, w1a_ref)
    h = _gelu(group_norm(h, cin0, g1a_ref, b1a_ref))
    h = conv3x3(h, cp0, w1b_ref)
    h = group_norm(h, cin0, g1b_ref, b1b_ref)
    r = _gelu(x0 + h)

    # --- DoubleConv #2 (cin0 -> cmid -> cout) --------------------------------
    h = conv3x3(r, cp0, w2a_ref)
    h = _gelu(group_norm(h, cmid, g2a_ref, b2a_ref))
    h = conv3x3(h, cpm, w2b_ref)
    h = group_norm(h, cout, g2b_ref, b2b_ref)

    # --- add broadcast time embedding; lane-dense (cout, 256) store ----------
    o_ref[0] = h + emb_ref[0]


# ------------------------------ host helpers ------------------------------
def _bilinear_matrix(n_in, n_out):
    """1-D bilinear resize matrix with align_corners=True (nn.Upsample)."""
    m = np.zeros((n_out, n_in), np.float32)
    if n_in == 1:
        m[:, 0] = 1.0
        return jnp.asarray(m)
    src = np.arange(n_out, dtype=np.float64) * (n_in - 1) / (n_out - 1)
    lo = np.clip(np.floor(src).astype(np.int64), 0, n_in - 2)
    frac = (src - lo).astype(np.float32)
    m[np.arange(n_out), lo] = 1.0 - frac
    m[np.arange(n_out), lo + 1] += frac
    return jnp.asarray(m)


def _tap_masks(H, W):
    """(9, H*W) f32 validity masks for the 9 conv taps on the flattened image."""
    hw = H * W
    r = np.arange(hw) // W
    c = np.arange(hw) % W
    m = np.zeros((9, hw), np.float32)
    for t, (dh, dw) in enumerate(_TAPS):
        m[t] = ((r + dh >= 0) & (r + dh < H) &
                (c + dw >= 0) & (c + dw < W)).astype(np.float32)
    return jnp.asarray(m)


def _prep_conv_weight(w, cpi, cpo):
    """(3,3,cin,cout) HWIO weights -> zero-padded (cpo, 9*cpi) matmul matrix."""
    kh, kw, cin, cout = w.shape
    wp = jnp.zeros((kh, kw, cpi, cpo), jnp.float32)
    wp = wp.at[:, :, :cin, :cout].set(w.astype(jnp.float32))
    return jnp.transpose(wp, (3, 0, 1, 2)).reshape(cpo, kh * kw * cpi)


def _prep_gn_param(v, cp):
    v = v.reshape(-1).astype(jnp.float32)
    return jnp.zeros((cp, 1), jnp.float32).at[:v.shape[0], 0].set(v)


# ------------------------------ host wrapper ------------------------------
def up_forward(x, skip_x, t, params):
    """x: (B, Cx, H/2, W/2), skip_x: (B, Cs, H, W), t: (B, emb_dim)  [NCHW]."""
    x = x.astype(jnp.float32)
    skip_x = skip_x.astype(jnp.float32)
    t = t.astype(jnp.float32)

    B, cx, h_in, w_in = x.shape
    _, cs, H, W = skip_x.shape
    HW, hw_in = H * W, h_in * w_in
    cin0 = cs + cx
    cmid = params['w2a'].shape[-1]
    cout = params['w2b'].shape[-1]
    cp0, cpm = _rup8(cin0), _rup8(cmid)

    # NCHW is already channel-major; flattening H*W is free (no transposes).
    x_flat = x.reshape(B, cx, hw_in)
    skip_flat = skip_x.reshape(B, cs, HW)

    # bilinear x2 upsample (align_corners=True) folded into a single matrix
    up_mat = jnp.kron(_bilinear_matrix(h_in, H),
                      _bilinear_matrix(w_in, W)).T          # (hw_in, HW)
    masks = _tap_masks(H, W)                                # (9, HW)

    # time embedding hoisted out of the kernel (one batched XLA matmul)
    emb = jnp.dot(jax.nn.silu(t), params['wl'],
                  precision=jax.lax.Precision.HIGHEST) + params['bl']
    emb3 = emb.reshape(B, cout, 1)

    # conv weights as single matmul matrices (channels zero-padded to x8)
    w1a = _prep_conv_weight(params['w1a'], cp0, cp0)
    w1b = _prep_conv_weight(params['w1b'], cp0, cp0)
    w2a = _prep_conv_weight(params['w2a'], cp0, cpm)
    w2b = _prep_conv_weight(params['w2b'], cpm, cout)
    g1a = _prep_gn_param(params['g1a'], cp0)
    b1a = _prep_gn_param(params['b1a'], cp0)
    g1b = _prep_gn_param(params['g1b'], cp0)
    b1b = _prep_gn_param(params['b1b'], cp0)
    g2a = _prep_gn_param(params['g2a'], cpm)
    b2a = _prep_gn_param(params['b2a'], cpm)
    g2b = _prep_gn_param(params['g2b'], cout)
    b2b = _prep_gn_param(params['b2b'], cout)

    def bcast(shape):
        n = len(shape)
        return pl.BlockSpec(shape, lambda b, n=n: (0,) * n)

    kernel = functools.partial(
        _up_kernel, H=H, W=W, cs=cs, cin0=cin0, cmid=cmid, cout=cout,
        cp0=cp0, cpm=cpm, roll_sign=_roll_sign())

    out_flat = pl.pallas_call(
        kernel,
        out_shape=jax.ShapeDtypeStruct((B, cout, HW), jnp.float32),
        grid=(B,),
        in_specs=[
            pl.BlockSpec((1, cx, hw_in), lambda b: (b, 0, 0)),
            pl.BlockSpec((1, cs, HW), lambda b: (b, 0, 0)),
            pl.BlockSpec((1, cout, 1), lambda b: (b, 0, 0)),
            bcast(up_mat.shape), bcast(masks.shape),
            bcast(w1a.shape), bcast(g1a.shape), bcast(b1a.shape),
            bcast(w1b.shape), bcast(g1b.shape), bcast(b1b.shape),
            bcast(w2a.shape), bcast(g2a.shape), bcast(b2a.shape),
            bcast(w2b.shape), bcast(g2b.shape), bcast(b2b.shape),
        ],
        out_specs=pl.BlockSpec((1, cout, HW), lambda b: (b, 0, 0)),
        scratch_shapes=[
            pltpu.VMEM((9 * max(cp0, cpm), HW), jnp.float32),   # im2col patch
            pltpu.VMEM((cp0, HW), jnp.float32),                 # concat buffer
        ],
        compiler_params=pltpu.CompilerParams(
            dimension_semantics=("parallel",)),
    )(x_flat, skip_flat, emb3, up_mat, masks,
      w1a, g1a, b1a, w1b, g1b, b1b, w2a, g2a, b2a, w2b, g2b, b2b)

    return out_flat.reshape(B, cout, H, W)


# ------------------------- pure-JAX (XLA) reference -------------------------
def up_reference(x, skip_x, t, params):
    x = x.astype(jnp.float32)
    skip_x = skip_x.astype(jnp.float32)
    t = t.astype(jnp.float32)
    _, _, h_in, w_in = x.shape
    _, _, H, W = skip_x.shape
    hi = jax.lax.Precision.HIGHEST

    mh = _bilinear_matrix(h_in, H)
    mw = _bilinear_matrix(w_in, W)
    xu = jnp.einsum('pi,bcij,qj->bcpq', mh, x, mw, precision=hi)
    xc = jnp.concatenate([skip_x, xu], axis=1)

    def conv(v, w):
        return jax.lax.conv_general_dilated(
            v, w, window_strides=(1, 1), padding='SAME',
            dimension_numbers=('NCHW', 'HWIO', 'NCHW'), precision=hi)

    def gn(v, g, b):
        mean = jnp.mean(v, axis=(1, 2, 3), keepdims=True)
        var = jnp.mean((v - mean) ** 2, axis=(1, 2, 3), keepdims=True)
        vn = (v - mean) * jax.lax.rsqrt(var + _GN_EPS)
        return vn * g.reshape(1, -1, 1, 1) + b.reshape(1, -1, 1, 1)

    gelu = lambda v: jax.nn.gelu(v, approximate=False)

    h = conv(xc, params['w1a'])
    h = gelu(gn(h, params['g1a'], params['b1a']))
    h = conv(h, params['w1b'])
    h = gn(h, params['g1b'], params['b1b'])
    r = gelu(xc + h)
    h = conv(r, params['w2a'])
    h = gelu(gn(h, params['g2a'], params['b2a']))
    h = conv(h, params['w2b'])
    h = gn(h, params['g2b'], params['b2b'])

    emb = jnp.dot(jax.nn.silu(t), params['wl'], precision=hi) + params['bl']
    return h + emb[:, :, None, None]


# --------------------------- deterministic params --------------------------
def init_params(key, in_channels, out_channels, emb_dim):
    mid = in_channels // 2
    ks = jax.random.split(key, 6)

    def conv_w(k, cin, cout):
        scale = 1.0 / np.sqrt(9.0 * cin)
        # stored as (kh, kw, cin, cout)  (HWIO)
        return scale * jax.random.normal(k, (3, 3, cin, cout), jnp.float32)

    return {
        # DoubleConv #1 (residual): in -> in -> in
        'w1a': conv_w(ks[0], in_channels, in_channels),
        'g1a': jnp.ones((1, in_channels), jnp.float32),
        'b1a': jnp.zeros((1, in_channels), jnp.float32),
        'w1b': conv_w(ks[1], in_channels, in_channels),
        'g1b': jnp.ones((1, in_channels), jnp.float32),
        'b1b': jnp.zeros((1, in_channels), jnp.float32),
        # DoubleConv #2: in -> in//2 -> out
        'w2a': conv_w(ks[2], in_channels, mid),
        'g2a': jnp.ones((1, mid), jnp.float32),
        'b2a': jnp.zeros((1, mid), jnp.float32),
        'w2b': conv_w(ks[3], mid, out_channels),
        'g2b': jnp.ones((1, out_channels), jnp.float32),
        'b2b': jnp.zeros((1, out_channels), jnp.float32),
        # emb_layer: Linear(emb_dim -> out_channels), stored as (emb_dim, out)
        'wl': (1.0 / np.sqrt(emb_dim)) *
              jax.random.normal(ks[4], (emb_dim, out_channels), jnp.float32),
        'bl': 0.1 * jax.random.normal(ks[5], (1, out_channels), jnp.float32),
    }


if __name__ == "__main__":
    key = jax.random.PRNGKey(0)
    kx, ks, kt, kp = jax.random.split(key, 4)

    B = 2
    in_channels = 8          # channels AFTER concat([skip_x, upsampled x])
    out_channels = 4
    emb_dim = 32
    H = W = 16

    x = jax.random.normal(kx, (B, in_channels // 2, H // 2, W // 2), jnp.float32)
    skip_x = jax.random.normal(ks, (B, in_channels // 2, H, W), jnp.float32)
    t = jax.random.normal(kt, (B, emb_dim), jnp.float32)
    params = init_params(kp, in_channels, out_channels, emb_dim)

    out = jax.block_until_ready(up_forward(x, skip_x, t, params))
    assert out.shape == (B, out_channels, H, W), out.shape
    assert bool(jnp.all(jnp.isfinite(out)))

    # numerics check against a pure-JAX/XLA reference of the PyTorch module
    ref = jax.block_until_ready(up_reference(x, skip_x, t, params))
    err = float(jnp.max(jnp.abs(out - ref)))
    assert err < 2e-3, f"kernel/reference mismatch: max|diff|={err}"
    print("KERNEL_OK")
</pallas_src>

<mosaic_0001>
module attributes {stable_mosaic.version = 11 : i64} {
  func.func @k(%arg0: memref<8x256xf32, #tpu.memory_space<vmem>>, %arg1: memref<8x256xf32, #tpu.memory_space<vmem>>) attributes {dimension_semantics = [], scalar_prefetch = 0 : i64, scratch_operands = 0 : i64, tpu.core_type = #tpu.core_type<tc>} {
    %c0 = arith.constant 0 : index
    %c0_0 = arith.constant 0 : index
    %0 = vector.load %arg0[%c0, %c0_0] : memref<8x256xf32, #tpu.memory_space<vmem>>, vector<8x256xf32>
    %c3_i32 = arith.constant 3 : i32
    %1 = tpu.dynamic_rotate %0 by %c3_i32 dim 1 : vector<8x256xf32>, i32 -> vector<8x256xf32>
    %c0_1 = arith.constant 0 : index
    %c0_2 = arith.constant 0 : index
    %2 = vector.load %arg1[%c0_1, %c0_2] : memref<8x256xf32, #tpu.memory_space<vmem>>, vector<8x256xf32>
    tpu.vector_store %arg1[%c0_1, %c0_2], %1 {strides = array<i32>} : memref<8x256xf32, #tpu.memory_space<vmem>>, vector<8x256xf32>,
    return
  }
}

</mosaic_0001>

<bundles_post_ra>
// kernel: tpu_custom_call.1
= control target key start
LH: loop header
LB: loop body
LE: loop exit
PB: predicated region body
PF: predicated region fallthrough
CT: control target
= control target key end

     0   :  { %6 = vsyncpa [#allocation3], 0  ;;  %s115_s0 = inlined_call_operand.hbm [shape: f32[8,256], index: 0, kind: input, shape index: {}]   ;;  %s116_s1 = inlined_call_operand.hbm [shape: f32[8,256], index: 1, kind: output, shape index: {}]  }
   0x1   :  { %7 = vsyncpa [#allocation4], 0  ;;  %s96_s6 = smov [#allocation2]  }
   0x2   :  { %s14_s7 = sshll.u32 %s96_s6, 4  ;;  %s15_s7 = int_to_ptr.vmem [resolvable:$true] %s14_s7 }
   0x3   :  { %s60_s8 = scalar_lea.vmem %s15_s7, 256  ;;  %p65_p1 = scmp.lt.s32.totalorder %s15_s7, %s15_s7 }
   0x4   :  { %p61_p0 = scmp.ne.s32.totalorder %s15_s7, %s60_s8  ;;  %p66_p2 = scmp.lt.s32.totalorder %s60_s8, %s60_s8 }
   0x6   :  { %p67_p3 = por %p66_p2, %p65_p1 }
   0x8   :  { %p68_p4 = pnand %p67_p3, %p61_p0 }
   0xa   :  { %71 = shalt.err (!%p68_p4)
}
   0xb   :  { %17 = dma.hbm_to_vmem [thread:$0]  %s115_s0, 256, %s15_s7, [#allocation3]  }
   0xc   :  { %92 = dma.done.wait [#allocation3], 256  }
   0xd   :  { %93 = vsyncadd [#allocation3], 4294967040  ;;  %v21_v0 = vld [vmem:[#allocation2] sm:$0xff]  ;;  %s97_s11 = smov 3   ;;  %v22_v1 = vld [vmem:[#allocation2 + $0x8] sm:$0xff]  ;;  %v27_v2 = vlaneseq  ;;  %s98_s12 = smov [#allocation5]  }
   0xe   :  { %23 = vrot.lane.b32.xlu0 %v21_v0, %s97_s11  ;;  %s40_s13 = sshll.u32 %s98_s12, 4  ;;  %s41_s13 = int_to_ptr.vmem [resolvable:$true] %s40_s13 }
   0xf   :  { %v28_v3 = vand.u32 127, %v27_v2  ;;  %s72_s0 = scalar_lea.vmem %s41_s13, 256  ;;  %p77_p6 = scmp.lt.s32.totalorder %s41_s13, %s41_s13 }
  0x10   :  { %p73_p5 = scmp.ne.s32.totalorder %s41_s13, %s72_s0  ;;  %p78_p7 = scmp.lt.s32.totalorder %s72_s0, %s72_s0 }
  0x11   :  { %vm29_vm0 = vcmp.lt.s32.totalorder %v28_v3, 3 }
  0x12   :  { %25 = vrot.lane.b32.xlu0 %v22_v1, %s97_s11  ;;  %p79_p8 = por %p78_p7, %p77_p6 }
  0x14   :  { %p80_p9 = pnand %p79_p8, %p73_p5 }
  0x80   :  { %v24_v4 = vpop.permute.xlu0 %23 }
  0x84   :  { %v26_v5 = vpop.permute.xlu0 %25 }
  0x85   :  { %v30_v6 = vsel %vm29_vm0, %v24_v4, %v26_v5  ;;  %v31_v7 = vsel %vm29_vm0, %v26_v5, %v24_v4 }
  0x86   :  { %32 = vst [vmem:[#allocation5] sm:$0xff] %v31_v7  ;;  %33 = vst [vmem:[#allocation5 + $0x8] sm:$0xff] %v30_v6 }
  0x87   :  { %83 = shalt.err (!%p80_p9)
}
  0x88   :  { %43 = dma.vmem_to_hbm [thread:$0]  %s41_s13, 256, %s116_s1, [#allocation4]  }
  0x89   :  { %94 = dma.done.wait [#allocation4], 256  }
  0x8a   :  { %95 = vsyncadd [#allocation4], 4294967040 }
  0x8b   :  { %47 = vsyncpa [#allocation3], 1 }
  0x8c   :  { %48 = vsyncpa [#allocation4], 1 }

</bundles_post_ra>
